<compile_context>
chip_gen: v7x
topology: tpu7x:2x2x1
jax: 0.10.0
libtpu: 0.0.40
codegen_flags: <defaults>
</compile_context>

<pallas_src>
import jax
import jax.numpy as jnp
from jax.experimental import pallas as pl
from jax.experimental.pallas import tpu as pltpu

LANE = 128
SUBLANE = 8


def _round_up(x, m):
    return (x + m - 1) // m * m


def mlp_kernel(x_ref, w1_ref, b1_ref, w2_ref, b2_ref, w3_ref, b3_ref, o_ref):
    # One batch tile [TB, D_in] per grid step; weights/biases are VMEM-resident
    # (constant index_maps -> DMA'd once, never re-fetched).
    x = x_ref[...].astype(jnp.bfloat16)             # in-kernel cast, hidden under MXU

    # linear1 + ReLU  (bf16 MXU dot, f32 accumulate; elementwise kept f32)
    h1 = jnp.dot(x, w1_ref[...], preferred_element_type=jnp.float32) + b1_ref[...]
    h1 = jnp.maximum(h1, 0.0)

    # Dropout(p=0.2): identity at inference time (PyTorch eval semantics).
    # TODO(synk): training-mode dropout would need pltpu.prng_seed + prng_random_bits
    #             with 1/(1-p) scaling.

    # linear2 + tanh  (tanh lowers to the EUP slot)
    h2 = jnp.dot(h1.astype(jnp.bfloat16), w2_ref[...],
                 preferred_element_type=jnp.float32) + b2_ref[...]
    h2 = jnp.tanh(h2)

    # linear3 -> f32 output written directly at the logical column width
    o_ref[...] = jnp.dot(h2.astype(jnp.bfloat16), w3_ref[...],
                         preferred_element_type=jnp.float32) + b3_ref[...]


def prepare_params(params, *, pad_hidden=True):
    """One-time per-model prep (hoisted out of the per-call path):
    bf16 weight casts + optional lane-dense (multiple-of-128) hidden-dim padding.
    The hidden pad is numerically exact: padded h1/h2 columns are ReLU(0)=0 / tanh(0)=0
    and the corresponding padded w2/w3 rows are zero."""
    w1, b1 = params["w1"], params["b1"]
    w2, b2 = params["w2"], params["b2"]
    w3, b3 = params["w3"], params["b3"]
    if pad_hidden:
        H_p = _round_up(w1.shape[1], LANE)
        H2_p = _round_up(w2.shape[1], LANE)
        w1 = jnp.pad(w1, ((0, 0), (0, H_p - w1.shape[1])))
        b1 = jnp.pad(b1, ((0, 0), (0, H_p - b1.shape[1])))
        w2 = jnp.pad(w2, ((0, H_p - w2.shape[0]), (0, H2_p - w2.shape[1])))
        b2 = jnp.pad(b2, ((0, 0), (0, H2_p - b2.shape[1])))
        w3 = jnp.pad(w3, ((0, H2_p - w3.shape[0]), (0, 0)))
    return {
        "w1": w1.astype(jnp.bfloat16), "b1": b1.astype(jnp.float32),
        "w2": w2.astype(jnp.bfloat16), "b2": b2.astype(jnp.float32),
        "w3": w3.astype(jnp.bfloat16), "b3": b3.astype(jnp.float32),
    }


def _choose_tile(B, tb):
    """Pick (tile_rows, padded_batch).  Rows are a multiple of 8 (f32 sublane).
    Guarantees >=2 grid steps when B>=16 (v7x megacore sharding) and picks the tile
    so that padding of x is minimal (usually zero)."""
    B_r = _round_up(B, SUBLANE)
    nsteps = max(pl.cdiv(B_r, max(SUBLANE, tb)), 2 if B_r >= 2 * SUBLANE else 1)
    tb_eff = _round_up(pl.cdiv(B_r, nsteps), SUBLANE)
    B_pad = tb_eff * nsteps
    return tb_eff, B_pad


def net_forward(x, prepared, *, tb=2048):
    """x: [B, D_in] float32.  prepared: output of prepare_params()."""
    B, D_in = x.shape
    w1, b1 = prepared["w1"], prepared["b1"]
    w2, b2 = prepared["w2"], prepared["b2"]
    w3, b3 = prepared["w3"], prepared["b3"]
    H = w1.shape[1]
    H2 = w2.shape[1]
    D_out = w3.shape[1]

    tb_eff, B_pad = _choose_tile(B, tb)
    if B_pad != B:
        x = jnp.pad(x, ((0, B_pad - B), (0, 0)))

    grid = (B_pad // tb_eff,)
    const = lambda i: (0, 0)

    cost = pl.CostEstimate(
        flops=2 * B_pad * (D_in * H + H * H2 + H2 * D_out),
        transcendentals=B_pad * H2,
        bytes_accessed=(x.size * 4 + B_pad * D_out * 4
                        + (w1.size + w2.size + w3.size) * 2
                        + (b1.size + b2.size + b3.size) * 4),
    )

    out = pl.pallas_call(
        mlp_kernel,
        out_shape=jax.ShapeDtypeStruct((B_pad, D_out), jnp.float32),
        grid_spec=pltpu.PrefetchScalarGridSpec(
            num_scalar_prefetch=0,
            grid=grid,
            in_specs=[
                pl.BlockSpec((tb_eff, D_in), lambda i: (i, 0)),   # streamed f32 x tile
                pl.BlockSpec((D_in, H), const),                   # resident weights/biases
                pl.BlockSpec((1, H), const),
                pl.BlockSpec((H, H2), const),
                pl.BlockSpec((1, H2), const),
                pl.BlockSpec((H2, D_out), const),
                pl.BlockSpec((1, D_out), const),
            ],
            out_specs=pl.BlockSpec((tb_eff, D_out), lambda i: (i, 0)),
        ),
        compiler_params=pltpu.CompilerParams(
            dimension_semantics=("parallel",),          # v7x: shard batch over both TCs
            vmem_limit_bytes=32 * 1024 * 1024,          # never binding at these sizes
        ),
        cost_estimate=cost,
    )(x, w1, b1, w2, b2, w3, b3)

    return out[:B] if B_pad != B else out


def init_params(key, D_in, H, D_out):
    """nn.Linear-style init (uniform +/- 1/sqrt(fan_in)); weights pre-transposed to [in, out]."""
    def linear(k, fan_in, fan_out):
        kw, kb = jax.random.split(k)
        bound = 1.0 / jnp.sqrt(fan_in)
        w = jax.random.uniform(kw, (fan_in, fan_out), jnp.float32, -bound, bound)
        b = jax.random.uniform(kb, (1, fan_out), jnp.float32, -bound, bound)
        return w, b

    k1, k2, k3 = jax.random.split(key, 3)
    w1, b1 = linear(k1, D_in, H)
    w2, b2 = linear(k2, H, 64)
    w3, b3 = linear(k3, 64, D_out)
    return {"w1": w1, "b1": b1, "w2": w2, "b2": b2, "w3": w3, "b3": b3}


def net_forward_ref(x, p):
    """Plain-JAX reference with the same bf16-operand / f32-accumulate numerics,
    using the original (unpadded) parameters."""
    bf = jnp.bfloat16
    h1 = jnp.maximum(
        jnp.dot(x.astype(bf), p["w1"].astype(bf),
                preferred_element_type=jnp.float32) + p["b1"], 0.0)
    h2 = jnp.tanh(
        jnp.dot(h1.astype(bf), p["w2"].astype(bf),
                preferred_element_type=jnp.float32) + p["b2"])
    return jnp.dot(h2.astype(bf), p["w3"].astype(bf),
                   preferred_element_type=jnp.float32) + p["b3"]


if __name__ == "__main__":
    B, D_in, H, D_out = 8, 32, 64, 16

    key = jax.random.PRNGKey(0)
    kx, kp = jax.random.split(key)
    x = jax.random.normal(kx, (B, D_in), jnp.float32)
    params = init_params(kp, D_in, H, D_out)

    prepared = prepare_params(params)            # one-time: bf16 cast + hidden pad
    out = jax.block_until_ready(net_forward(x, prepared))

    ref = net_forward_ref(x, params)
    assert out.shape == (B, D_out)
    assert jnp.allclose(out, ref, atol=1e-4, rtol=1e-4), \
        float(jnp.max(jnp.abs(out - ref)))

    print("KERNEL_OK")
</pallas_src>

<mosaic_0001>
module attributes {stable_mosaic.version = 11 : i64} {
  func.func @mlp_kernel(%arg0: i32, %arg1: memref<8x32xf32, #tpu.memory_space<vmem>>, %arg2: memref<32x128xbf16, #tpu.memory_space<vmem>>, %arg3: memref<1x128xf32, #tpu.memory_space<vmem>>, %arg4: memref<128x128xbf16, #tpu.memory_space<vmem>>, %arg5: memref<1x128xf32, #tpu.memory_space<vmem>>, %arg6: memref<128x16xbf16, #tpu.memory_space<vmem>>, %arg7: memref<1x16xf32, #tpu.memory_space<vmem>>, %arg8: memref<8x16xf32, #tpu.memory_space<vmem>>) attributes {dimension_semantics = [#tpu.dimension_semantics<parallel>], iteration_bounds = array<i64: 1>, scalar_prefetch = 0 : i64, scratch_operands = 0 : i64, tpu.core_type = #tpu.core_type<tc>, window_params = [{transform_indices = @transform_0, window_bounds = array<i64: 8, 32>}, {pipeline_mode = #tpu.pipeline_mode<synchronous>, transform_indices = @transform_1, window_bounds = array<i64: 32, 128>}, {pipeline_mode = #tpu.pipeline_mode<synchronous>, transform_indices = @transform_2, window_bounds = array<i64: 1, 128>}, {pipeline_mode = #tpu.pipeline_mode<synchronous>, transform_indices = @transform_3, window_bounds = array<i64: 128, 128>}, {pipeline_mode = #tpu.pipeline_mode<synchronous>, transform_indices = @transform_4, window_bounds = array<i64: 1, 128>}, {pipeline_mode = #tpu.pipeline_mode<synchronous>, transform_indices = @transform_5, window_bounds = array<i64: 128, 16>}, {pipeline_mode = #tpu.pipeline_mode<synchronous>, transform_indices = @transform_6, window_bounds = array<i64: 1, 16>}, {transform_indices = @transform_7, window_bounds = array<i64: 8, 16>}]} {
    %c0 = arith.constant 0 : index
    %c0_0 = arith.constant 0 : index
    %0 = vector.load %arg1[%c0, %c0_0] : memref<8x32xf32, #tpu.memory_space<vmem>>, vector<8x32xf32>
    %1 = arith.truncf %0 : vector<8x32xf32> to vector<8x32xbf16>
    %c0_1 = arith.constant 0 : index
    %c0_2 = arith.constant 0 : index
    %2 = vector.load %arg2[%c0_1, %c0_2] : memref<32x128xbf16, #tpu.memory_space<vmem>>, vector<32x128xbf16>
    %cst = arith.constant dense<0.000000e+00> : vector<8x128xf32>
    %3 = tpu.matmul %1, %2, %cst {dimension_numbers = #tpu.dot_dimension_numbers<[1], [0], [0], [1], [0, 0, 1, 1], [], []>} : vector<8x32xbf16>, vector<32x128xbf16>, vector<8x128xf32> -> vector<8x128xf32>
    %c0_3 = arith.constant 0 : index
    %c0_4 = arith.constant 0 : index
    %4 = vector.load %arg3[%c0_3, %c0_4] : memref<1x128xf32, #tpu.memory_space<vmem>>, vector<1x128xf32>
    %5 = vector.broadcast %4 : vector<1x128xf32> to vector<8x128xf32>
    %6 = arith.addf %3, %5 : vector<8x128xf32>
    %cst_5 = arith.constant 0.000000e+00 : f32
    %7 = vector.broadcast %cst_5 : f32 to vector<8x128xf32>
    %8 = arith.maximumf %6, %7 : vector<8x128xf32>
    %9 = arith.truncf %8 : vector<8x128xf32> to vector<8x128xbf16>
    %c0_6 = arith.constant 0 : index
    %c0_7 = arith.constant 0 : index
    %10 = vector.load %arg4[%c0_6, %c0_7] : memref<128x128xbf16, #tpu.memory_space<vmem>>, vector<128x128xbf16>
    %cst_8 = arith.constant dense<0.000000e+00> : vector<8x128xf32>
    %11 = tpu.matmul %9, %10, %cst_8 {dimension_numbers = #tpu.dot_dimension_numbers<[1], [0], [0], [1], [0, 0, 1, 1], [], []>} : vector<8x128xbf16>, vector<128x128xbf16>, vector<8x128xf32> -> vector<8x128xf32>
    %c0_9 = arith.constant 0 : index
    %c0_10 = arith.constant 0 : index
    %12 = vector.load %arg5[%c0_9, %c0_10] : memref<1x128xf32, #tpu.memory_space<vmem>>, vector<1x128xf32>
    %13 = vector.broadcast %12 : vector<1x128xf32> to vector<8x128xf32>
    %14 = arith.addf %11, %13 : vector<8x128xf32>
    %15 = math.tanh %14 : vector<8x128xf32>
    %16 = arith.truncf %15 : vector<8x128xf32> to vector<8x128xbf16>
    %c0_11 = arith.constant 0 : index
    %c0_12 = arith.constant 0 : index
    %17 = vector.load %arg6[%c0_11, %c0_12] : memref<128x16xbf16, #tpu.memory_space<vmem>>, vector<128x16xbf16>
    %cst_13 = arith.constant dense<0.000000e+00> : vector<8x16xf32>
    %18 = tpu.matmul %16, %17, %cst_13 {dimension_numbers = #tpu.dot_dimension_numbers<[1], [0], [0], [1], [0, 0, 1, 1], [], []>} : vector<8x128xbf16>, vector<128x16xbf16>, vector<8x16xf32> -> vector<8x16xf32>
    %c0_14 = arith.constant 0 : index
    %c0_15 = arith.constant 0 : index
    %19 = vector.load %arg7[%c0_14, %c0_15] : memref<1x16xf32, #tpu.memory_space<vmem>>, vector<1x16xf32>
    %20 = vector.broadcast %19 : vector<1x16xf32> to vector<8x16xf32>
    %21 = arith.addf %18, %20 : vector<8x16xf32>
    %c0_16 = arith.constant 0 : index
    %c0_17 = arith.constant 0 : index
    %22 = vector.load %arg8[%c0_16, %c0_17] : memref<8x16xf32, #tpu.memory_space<vmem>>, vector<8x16xf32>
    tpu.vector_store %arg8[%c0_16, %c0_17], %21 {strides = array<i32>} : memref<8x16xf32, #tpu.memory_space<vmem>>, vector<8x16xf32>,
    return
  }
  func.func @transform_0(%arg0: i32) -> (i32, i32) {
    %c0_i32 = arith.constant 0 : i32
    %c0_i32_0 = arith.constant 0 : i32
    return %arg0, %c0_i32 : i32, i32
  }
  func.func @transform_1(%arg0: i32) -> (i32, i32) {
    %c0_i32 = arith.constant 0 : i32
    %c0_i32_0 = arith.constant 0 : i32
    %c0_i32_1 = arith.constant 0 : i32
    return %c0_i32, %c0_i32_0 : i32, i32
  }
  func.func @transform_2(%arg0: i32) -> (i32, i32) {
    %c0_i32 = arith.constant 0 : i32
    %c0_i32_0 = arith.constant 0 : i32
    %c0_i32_1 = arith.constant 0 : i32
    return %c0_i32, %c0_i32_0 : i32, i32
  }
  func.func @transform_3(%arg0: i32) -> (i32, i32) {
    %c0_i32 = arith.constant 0 : i32
    %c0_i32_0 = arith.constant 0 : i32
    %c0_i32_1 = arith.constant 0 : i32
    return %c0_i32, %c0_i32_0 : i32, i32
  }
  func.func @transform_4(%arg0: i32) -> (i32, i32) {
    %c0_i32 = arith.constant 0 : i32
    %c0_i32_0 = arith.constant 0 : i32
    %c0_i32_1 = arith.constant 0 : i32
    return %c0_i32, %c0_i32_0 : i32, i32
  }
  func.func @transform_5(%arg0: i32) -> (i32, i32) {
    %c0_i32 = arith.constant 0 : i32
    %c0_i32_0 = arith.constant 0 : i32
    %c0_i32_1 = arith.constant 0 : i32
    return %c0_i32, %c0_i32_0 : i32, i32
  }
  func.func @transform_6(%arg0: i32) -> (i32, i32) {
    %c0_i32 = arith.constant 0 : i32
    %c0_i32_0 = arith.constant 0 : i32
    %c0_i32_1 = arith.constant 0 : i32
    return %c0_i32, %c0_i32_0 : i32, i32
  }
  func.func @transform_7(%arg0: i32) -> (i32, i32) {
    %c0_i32 = arith.constant 0 : i32
    %c0_i32_0 = arith.constant 0 : i32
    return %arg0, %c0_i32 : i32, i32
  }
}

</mosaic_0001>

<bundles_post_ra>
// kernel: tpu_custom_call.1
= control target key start
LH: loop header
LB: loop body
LE: loop exit
PB: predicated region body
PF: predicated region fallthrough
CT: control target
= control target key end

     0   :  { %12 = vsyncpa [#allocation3], 0  ;;  %s670_s0 = inlined_call_operand.hbm [shape: f32[8,32], index: 0, kind: input, shape index: {}]   ;;  %s671_s1 = inlined_call_operand.vmem [shape: bf16[32,128], index: 1, kind: input, shape index: {}]   ;;  %s672_s2 = inlined_call_operand.vmem [shape: f32[1,128], index: 2, kind: input, shape index: {}]   ;;  %s673_s3 = inlined_call_operand.vmem [shape: bf16[128,128], index: 3, kind: input, shape index: {}]   ;;  %s674_s4 = inlined_call_operand.vmem [shape: f32[1,128], index: 4, kind: input, shape index: {}]   ;;  %s675_s5 = inlined_call_operand.vmem [shape: bf16[128,16], index: 5, kind: input, shape index: {}]   ;;  %s676_s6 = inlined_call_operand.vmem [shape: f32[1,16], index: 6, kind: input, shape index: {}]   ;;  %s677_s7 = inlined_call_operand.hbm [shape: f32[8,16], index: 7, kind: output, shape index: {}]  }
   0x1   :  { %13 = vsyncpa [#allocation4], 0  ;;  %s515_s24 = smov [#allocation2]   ;;  %s467_s28 = scalar_lea.hbm %s670_s0, 128 }
   0x2   :  { %s20_s25 = sshll.u32 %s515_s24, 4  ;;  %p468_p0 = scmp.ne.s32.totalorder %s670_s0, %s467_s28  ;;  %s21_s25 = int_to_ptr.vmem [resolvable:$true] %s20_s25 }
   0x3   :  { %p471_p1 = scmp.lt.u32.totalorder %s467_s28, %s670_s0 }
   0x5   :  { %p473_p2 = pnand %p471_p1, %p468_p0 }
   0x7   :  { %476 = shalt.err (!%p473_p2)
}
   0x8   :  { %s477_s10 = scalar_lea.vmem %s21_s25, 128  ;;  %p482_p4 = scmp.lt.s32.totalorder %s21_s25, %s21_s25 }
   0x9   :  { %p478_p3 = scmp.ne.s32.totalorder %s21_s25, %s477_s10  ;;  %p483_p5 = scmp.lt.s32.totalorder %s477_s10, %s477_s10 }
   0xb   :  { %p484_p6 = por %p483_p5, %p482_p4 }
   0xd   :  { %p485_p7 = pnand %p484_p6, %p478_p3 }
   0xf   :  { %488 = shalt.err (!%p485_p7)
}
  0x10   :  { %23 = dma.hbm_to_vmem [thread:$0]  %s670_s0, 128, %s21_s25, [#allocation3]  }
  0x11   :  { %511 = dma.done.wait [#allocation3], 128  }
  0x12   :  { %512 = vsyncadd [#allocation3], 4294967168  ;;  %v516_v0 = vmov 0.0   ;;  %vm517_vm0 = vmmov 0   ;;  %v447_v1 = vld [vmem:[%s671_s1] sm:$0xff]   ;;  %v448_v2 = vld [vmem:[%s671_s1 + $0x8] sm:$0xff]  }
  0x13   :  { %395 = vmatprep.subr.bf16.mxu0 %v516_v0  ;;  %399 = vmatprep.mubr.msk.bf16.mxu0 %vm517_vm0, %v516_v0  ;;  %v40_v3 = vld [vmem:[#allocation2] sm:$0xff]  ;;  %v450_v6 = vld [vmem:[%s673_s3 + $0x8] sm:$0xff]   ;;  %vm65_vm1 = vcmask 261120   ;;  %v451_v7 = vld [vmem:[%s673_s3 + $0x10] sm:$0xff]   ;;  %s518_s26 = smov [#allocation5]   ;;  %vm335_vm2 = vcmask 130048  }
  0x14   :  { %403 = vmatprep.subr.bf16.mxu1 %v516_v0  ;;  %419 = vmatprep.mubr.msk.bf16.mxu1 %vm517_vm0, %v516_v0  ;;  %v449_v4 = vld [vmem:[%s673_s3] sm:$0xff]   ;;  %v41_v5 = vpack.c.bf16 %v40_v3, %v40_v3  ;;  %v452_v8 = vld [vmem:[%s673_s3 + $0x18] sm:$0xff]   ;;  %v454_v10 = vld [vmem:[%s673_s3 + $0x28] sm:$0xff]  }
  0x15   :  { %396 = vmatpush3.bf16.msra.mxu0 %v447_v1  ;;  %404 = vmatpush3.bf16.msra.mxu1 %v449_v4  ;;  %v453_v9 = vld [vmem:[%s673_s3 + $0x20] sm:$0xff]   ;;  %v455_v11 = vld [vmem:[%s673_s3 + $0x30] sm:$0xff]   ;;  %v456_v12 = vld [vmem:[%s673_s3 + $0x38] sm:$0xff]  }
  0x16   :  { %397 = vmatprep.subr.bf16.mxu0 %v516_v0  ;;  %405 = vmatprep.subr.bf16.mxu1 %v516_v0  ;;  %v457_v13 = vld [vmem:[%s675_s5] sm:$0xff]   ;;  %v458_v14 = vld [vmem:[%s675_s5 + $0x8] sm:$0xff]   ;;  %v459_v15 = vld [vmem:[%s675_s5 + $0x10] sm:$0xff]  }
  0x17   :  { %v460_v16 = vld [vmem:[%s675_s5 + $0x18] sm:$0xff]   ;;  %v352_v17 = vld [vmem:[%s672_s2] ss:$0 sm:$0xff]  ;;  %v462_v26 = vld [vmem:[%s675_s5 + $0x28] sm:$0xff]  }
  0x18   :  { %v461_v25 = vld [vmem:[%s675_s5 + $0x20] sm:$0xff]   ;;  %v463_v27 = vld [vmem:[%s675_s5 + $0x30] sm:$0xff]   ;;  %v464_v28 = vld [vmem:[%s675_s5 + $0x38] sm:$0xff]   ;;  %s343_s5 = sshll.u32 %s518_s26, 4  ;;  %s344_s5 = int_to_ptr.vmem [resolvable:$true] %s343_s5 }
  0x19   :  { %398 = vmatpush3.bf16.msra.mxu0 %v448_v2  ;;  %406 = vmatpush3.bf16.msra.mxu1 %v450_v6  ;;  %v356_v29 = vld [vmem:[%s674_s4] ss:$0 sm:$0xff]  ;;  %s489_s4 = scalar_lea.vmem %s344_s5, 128  ;;  %p494_p9 = scmp.lt.s32.totalorder %s344_s5, %s344_s5 }
  0x1a   :  { %423 = vmatprep.subr.bf16.mxu0 %v516_v0  ;;  %407 = vmatprep.subr.bf16.mxu1 %v516_v0  ;;  %v365_v37 = vld [vmem:[%s676_s6] ss:$0 sm:$0xff]  ;;  %p490_p8 = scmp.ne.s32.totalorder %s344_s5, %s489_s4  ;;  %p495_p10 = scmp.lt.s32.totalorder %s489_s4, %s489_s4 }
  0x1c   :  { %400 = vmatmul.mubr.msk.bf16.vlgmr.msra.gmra.mrb[0].mxu0 %vm65_vm1, %v41_v5  ;;  %p496_p11 = por %p495_p10, %p494_p9 }
  0x1d   :  { %439 = vmatprep.mubr.msk.bf16.mxu0 %vm517_vm0, %v516_v0  ;;  %408 = vmatpush3.bf16.msra.mxu1 %v451_v7 }
  0x1e   :  { %409 = vmatprep.subr.bf16.mxu1 %v516_v0  ;;  %424 = vmatpush3.bf16.msra.mxu0 %v457_v13  ;;  %p497_p12 = pnand %p496_p11, %p490_p8 }
  0x1f   :  { %425 = vmatprep.subr.bf16.mxu0 %v516_v0 }
  0x21   :  { %410 = vmatpush3.bf16.msra.mxu1 %v452_v8 }
  0x22   :  { %411 = vmatprep.subr.bf16.mxu1 %v516_v0  ;;  %426 = vmatpush3.bf16.msra.mxu0 %v458_v14 }
  0x23   :  { %427 = vmatprep.subr.bf16.mxu0 %v516_v0 }
  0x25   :  { %412 = vmatpush3.bf16.msra.mxu1 %v453_v9 }
  0x26   :  { %413 = vmatprep.subr.bf16.mxu1 %v516_v0  ;;  %428 = vmatpush3.bf16.msra.mxu0 %v459_v15 }
  0x27   :  { %429 = vmatprep.subr.bf16.mxu0 %v516_v0 }
  0x29   :  { %414 = vmatpush3.bf16.msra.mxu1 %v454_v10 }
  0x2a   :  { %415 = vmatprep.subr.bf16.mxu1 %v516_v0  ;;  %430 = vmatpush3.bf16.msra.mxu0 %v460_v16 }
  0x2b   :  { %431 = vmatprep.subr.bf16.mxu0 %v516_v0 }
  0x2d   :  { %416 = vmatpush3.bf16.msra.mxu1 %v455_v11 }
  0x2e   :  { %417 = vmatprep.subr.bf16.mxu1 %v516_v0  ;;  %432 = vmatpush3.bf16.msra.mxu0 %v461_v25 }
  0x2f   :  { %433 = vmatprep.subr.bf16.mxu0 %v516_v0 }
  0x31   :  { %418 = vmatpush3.bf16.msra.mxu1 %v456_v12 }
  0x32   :  { %434 = vmatpush3.bf16.msra.mxu0 %v462_v26 }
  0x33   :  { %435 = vmatprep.subr.bf16.mxu0 %v516_v0 }
  0x36   :  { %436 = vmatpush3.bf16.msra.mxu0 %v463_v27 }
  0x37   :  { %437 = vmatprep.subr.bf16.mxu0 %v516_v0 }
  0x3a   :  { %438 = vmatpush3.bf16.msra.mxu0 %v464_v28 }
  0xef   :  { %v103_v18 = vpop.f32.mrb[0].mxu0 }
  0xf0   :  { %v104_v19 = vadd.f32 %v352_v17, %v103_v18  ;;  %v401_v20 = vpop.f32.mrb[1].mxu0 }
  0xf1   :  { %v106_v21 = vpop.f32.mrb[2].mxu0 }
  0xf2   :  { %v109_v22 = vmax.f32 %v104_v19, 0.0  ;;  %v402_v23 = vpop.f32.mrb[3].mxu0 }
  0xf4   :  { %v110_v24 = vpack.c.bf16 %v109_v22, %v109_v22 }
  0xf6   :  { %420 = vmatmul.mubr.bf16.vlgmr.msra.gmra.mrb[0].mxu1 %v110_v24 }
 0x1c9   :  { %v216_v30 = vpop.f32.mrb[0].mxu1 }
 0x1ca   :  { %v217_v31 = vadd.f32 %v356_v29, %v216_v30  ;;  %v421_v32 = vpop.f32.mrb[1].mxu1 }
 0x1cb   :  { %v219_v33 = vpop.f32.mrb[2].mxu1 }
 0x1cc   :  { %465 = vtanh.f32 %v217_v31  ;;  %v422_v34 = vpop.f32.mrb[3].mxu1 }
 0x1d6   :  { %v466_v35 = vpop.eup %465 }
 0x1d7   :  { %v223_v36 = vpack.c.bf16 %v466_v35, %v466_v35 }
 0x1d9   :  { %440 = vmatmul.mubr.bf16.vlgmr.msra.gmra.mrb[4].mxu0 %v223_v36 }
 0x2ac   :  { %v329_v38 = vpop.f32.mrb[4].mxu0 }
 0x2ad   :  { %v330_v39 = vadd.f32 %v365_v37, %v329_v38  ;;  %v441_v40 = vpop.f32.mrb[5].mxu0 }
 0x2ae   :  { %v332_v41 = vpop.f32.mrb[6].mxu0 }
 0x2af   :  { %v442_v42 = vpop.f32.mrb[7].mxu0  ;;  %336 = vst.msk [vmem:[#allocation5] sm:$0xff] %vm335_vm2, %v330_v39 }
 0x2b0   :  { %500 = shalt.err (!%p497_p12)
}
 0x2b1   :  { %s501_s6 = scalar_lea.hbm %s677_s7, 128 }
 0x2b2   :  { %p502_p13 = scmp.ne.s32.totalorder %s677_s7, %s501_s6  ;;  %p505_p0 = scmp.lt.u32.totalorder %s501_s6, %s677_s7 }
 0x2b4   :  { %p507_p1 = pnand %p505_p0, %p502_p13 }
 0x2b6   :  { %510 = shalt.err (!%p507_p1)
}
 0x2b7   :  { %346 = dma.vmem_to_hbm [thread:$0]  %s344_s5, 128, %s677_s7, [#allocation4]  }
 0x2b8   :  { %513 = dma.done.wait [#allocation4], 128  }
 0x2b9   :  { %514 = vsyncadd [#allocation4], 4294967168 }
 0x2ba   :  { %350 = vsyncpa [#allocation3], 1 }
 0x2bb   :  { %351 = vsyncpa [#allocation4], 1 }

</bundles_post_ra>
